<compile_context>
chip_gen: v7x
topology: tpu7x:2x2x1
jax: 0.10.0
libtpu: 0.0.40
codegen_flags: <defaults>
</compile_context>

<pallas_src>
import functools

import jax
import jax.numpy as jnp
from jax import lax
from jax.experimental import pallas as pl
from jax.experimental.pallas import tpu as pltpu

_BN_EPS = 1e-5


def _fused_model_kernel(patches_ref, wmat_ref, params_ref, scal_ref, out_ref,
                        *, ow_size, rows_per_ow):
    # Conv (stride == kernel) as a single im2col GEMM on the MXU: (P, K) @ (K, Cout).
    conv = jnp.dot(patches_ref[...], wmat_ref[...],
                   preferred_element_type=jnp.float32)

    params = params_ref[...]                      # (3, Cout): [conv_bias, gamma, beta]
    cbias = params[0:1, :]
    gamma = params[1:2, :]
    beta = params[2:3, :]

    act = jnp.maximum(conv + cbias, 0.0)          # ReLU on the VPU, (P, Cout)
    P = act.shape[0]

    # Per-row Linear(OW -> 1) weight: row p == (b, oh, ow) with ow fastest, so
    # lw[p] = lin_w[p % OW].  Synthesized from SMEM scalars (no (P,1) operand DMA).
    ow_col = lax.broadcasted_iota(jnp.int32, (P, 1), 0) % ow_size
    lw = jnp.zeros((P, 1), jnp.float32)
    sum_lw = jnp.float32(0.0)
    for j in range(ow_size):                      # statically unrolled (OW == 3)
        wj = scal_ref[j]
        lw = jnp.where(ow_col == j, wj, lw)
        sum_lw = sum_lw + wj
    sum_lw = sum_lw * rows_per_ow                 # Sum_p lw[p]  (scalar-only math)

    # BatchNorm (training-mode batch stats) + Linear + global sum as column reductions;
    # never materializes the (P, Cout) bn / weighted tiles.
    n = jnp.float32(P)
    s1 = jnp.sum(act, axis=0, keepdims=True)      # Sum_p act            (1, Cout)
    s2 = jnp.sum(act * act, axis=0, keepdims=True)  # Sum_p act^2        (1, Cout)
    sw = jnp.sum(act * lw, axis=0, keepdims=True)   # Sum_p act * lw[p]  (1, Cout)
    mean = s1 / n
    var = s2 / n - mean * mean                    # biased batch variance
    inv = lax.rsqrt(var + _BN_EPS)                # EUP rsqrt (free bundle slot)
    col = gamma * inv * (sw - mean * sum_lw) + beta * sum_lw   # (1, Cout)

    # Final lane reduction + Linear-bias term (lin_b * B*Cout*OH, precomputed in SMEM).
    out_ref[...] = jnp.sum(col, axis=1, keepdims=True) + scal_ref[ow_size]


def _forward(x, conv_w, conv_b, gamma, beta, lin_w, lin_b):
    B, Cin, H, W = x.shape
    Cout, _, KH, KW = conv_w.shape
    S = 3                                   # stride == kernel size
    OH = (H - KH) // S + 1
    OW = (W - KW) // S + 1
    P = B * OH * OW
    K = Cin * KH * KW

    # im2col in the wrapper (layout plumbing, ~6.5 KB): non-overlapping stride-3 patches.
    xc = x[:, :, :OH * S, :OW * S].astype(jnp.float32)
    patches = xc.reshape(B, Cin, OH, KH, OW, KW)
    patches = jnp.transpose(patches, (0, 2, 4, 1, 3, 5)).reshape(P, K)   # (P, K), no pad

    wmat = conv_w.reshape(Cout, K).T.astype(jnp.float32)                 # (K, Cout), no pad

    # Pack the three per-channel vectors into one operand -> one DMA instead of three.
    params = jnp.stack([conv_b, gamma, beta], axis=0).astype(jnp.float32)   # (3, Cout)

    # SMEM scalar pack: [lin_w[0..OW-1], lin_b * B*Cout*OH].
    lbias_total = (lin_b.reshape(()) * (B * Cout * OH)).reshape(1)
    scal = jnp.concatenate([lin_w.reshape(OW).astype(jnp.float32),
                            lbias_total.astype(jnp.float32)])               # (OW+1,)

    vmem = pl.BlockSpec(memory_space=pltpu.MemorySpace.VMEM)
    smem = pl.BlockSpec(memory_space=pltpu.MemorySpace.SMEM)

    kernel = functools.partial(_fused_model_kernel, ow_size=OW, rows_per_ow=B * OH)

    out = pl.pallas_call(
        kernel,
        out_shape=jax.ShapeDtypeStruct((1, 1), jnp.float32),
        in_specs=[vmem, vmem, vmem, smem],
        out_specs=vmem,
    )(patches, wmat, params, scal)

    return {"y": out[0, 0]}


_forward_jit = jax.jit(_forward)


def _reference(x, conv_w, conv_b, gamma, beta, lin_w, lin_b):
    """Pure-JAX reference of the same forward pass (for in-script validation)."""
    conv = lax.conv_general_dilated(x, conv_w, (3, 3), "VALID",
                                    dimension_numbers=("NCHW", "OIHW", "NCHW"))
    conv = conv + conv_b.reshape(1, -1, 1, 1)
    act = jnp.maximum(conv, 0.0)
    mean = jnp.mean(act, axis=(0, 2, 3), keepdims=True)
    var = jnp.mean((act - mean) ** 2, axis=(0, 2, 3), keepdims=True)
    bn = (act - mean) / jnp.sqrt(var + _BN_EPS)
    bn = bn * gamma.reshape(1, -1, 1, 1) + beta.reshape(1, -1, 1, 1)
    lin = jnp.einsum("bchw,ow->bcho", bn, lin_w) + lin_b
    return lin.sum()


class ModelForComparer:
    """JAX/Pallas port of the PyTorch module; forward(x) -> {'y': scalar}."""

    def __init__(self, key):
        k1, k2, k3, k4 = jax.random.split(key, 4)
        fan_in = 10 * 3 * 3
        bound = 1.0 / (fan_in ** 0.5)
        self.conv_w = jax.random.uniform(k1, (10, 10, 3, 3), jnp.float32, -bound, bound)
        self.conv_b = jax.random.uniform(k2, (10,), jnp.float32, -bound, bound)
        self.bn_gamma = jnp.ones((10,), jnp.float32)
        self.bn_beta = jnp.zeros((10,), jnp.float32)
        # TODO(synk): BatchNorm2d running_mean/running_var updates are training-time
        # state bookkeeping and do not affect the training-mode forward output; not modeled.
        lbound = 1.0 / (3 ** 0.5)
        self.lin_w = jax.random.uniform(k3, (1, 3), jnp.float32, -lbound, lbound)
        self.lin_b = jax.random.uniform(k4, (1,), jnp.float32, -lbound, lbound)

    def forward(self, x):
        return _forward_jit(x, self.conv_w, self.conv_b, self.bn_gamma,
                            self.bn_beta, self.lin_w, self.lin_b)

    __call__ = forward


if __name__ == "__main__":
    key = jax.random.PRNGKey(0)
    kx, kp = jax.random.split(key)
    # Conv2d(10,10,3,stride=3) followed by Linear(3,1) implies x: (B, 10, 9, 9) -> (B,10,3,3).
    x = jax.random.normal(kx, (2, 10, 9, 9), dtype=jnp.float32)

    model = ModelForComparer(kp)
    out = model(x)
    y = jax.block_until_ready(out["y"])

    assert y.shape == ()
    assert y.dtype == jnp.float32
    assert bool(jnp.isfinite(y))

    # Validate against the pure-JAX reference.
    y_ref = jax.block_until_ready(
        _reference(x, model.conv_w, model.conv_b, model.bn_gamma,
                   model.bn_beta, model.lin_w, model.lin_b))
    assert abs(float(y) - float(y_ref)) <= 1e-3 + 1e-3 * abs(float(y_ref)), (
        f"mismatch: pallas={float(y)} ref={float(y_ref)}")

    # Second call reuses the jit cache (no retrace, single kernel launch).
    out2 = model(x)
    jax.block_until_ready(out2["y"])

    print("KERNEL_OK")
</pallas_src>

<mosaic_0001>
module attributes {stable_mosaic.version = 11 : i64} {
  func.func @_fused_model_kernel(%arg0: memref<18x90xf32, #tpu.memory_space<vmem>>, %arg1: memref<90x10xf32, #tpu.memory_space<vmem>>, %arg2: memref<3x10xf32, #tpu.memory_space<vmem>>, %arg3: memref<4xf32, #tpu.memory_space<smem>>, %arg4: memref<1x1xf32, #tpu.memory_space<vmem>>) attributes {dimension_semantics = [], scalar_prefetch = 0 : i64, scratch_operands = 0 : i64, tpu.core_type = #tpu.core_type<tc>} {
    %c0 = arith.constant 0 : index
    %c0_0 = arith.constant 0 : index
    %0 = vector.load %arg0[%c0, %c0_0] : memref<18x90xf32, #tpu.memory_space<vmem>>, vector<18x90xf32>
    %c0_1 = arith.constant 0 : index
    %c0_2 = arith.constant 0 : index
    %1 = vector.load %arg1[%c0_1, %c0_2] : memref<90x10xf32, #tpu.memory_space<vmem>>, vector<90x10xf32>
    %cst = arith.constant dense<0.000000e+00> : vector<18x10xf32>
    %2 = tpu.matmul %0, %1, %cst {dimension_numbers = #tpu.dot_dimension_numbers<[1], [0], [0], [1], [0, 0, 1, 1], [], []>} : vector<18x90xf32>, vector<90x10xf32>, vector<18x10xf32> -> vector<18x10xf32>
    %c0_3 = arith.constant 0 : index
    %c0_4 = arith.constant 0 : index
    %3 = vector.load %arg2[%c0_3, %c0_4] : memref<3x10xf32, #tpu.memory_space<vmem>>, vector<3x10xf32>
    %4 = vector.extract_strided_slice %3 {offsets = [0, 0], sizes = [1, 10], strides = [1, 1]} : vector<3x10xf32> to vector<1x10xf32>
    %5 = vector.extract_strided_slice %3 {offsets = [1, 0], sizes = [1, 10], strides = [1, 1]} : vector<3x10xf32> to vector<1x10xf32>
    %6 = vector.extract_strided_slice %3 {offsets = [2, 0], sizes = [1, 10], strides = [1, 1]} : vector<3x10xf32> to vector<1x10xf32>
    %7 = vector.broadcast %4 : vector<1x10xf32> to vector<18x10xf32>
    %8 = arith.addf %2, %7 : vector<18x10xf32>
    %cst_5 = arith.constant 0.000000e+00 : f32
    %9 = vector.broadcast %cst_5 : f32 to vector<18x10xf32>
    %10 = arith.maximumf %8, %9 : vector<18x10xf32>
    %11 = tpu.iota {dimensions = array<i32: 0>} : vector<18x1xi32>
    %c3_i32 = arith.constant 3 : i32
    %c0_i32 = arith.constant 0 : i32
    %12 = arith.cmpi eq, %c3_i32, %c0_i32 : i32
    %c1_i32 = arith.constant 1 : i32
    %13 = arith.select %12, %c1_i32, %c3_i32 : i32
    %14 = vector.broadcast %13 : i32 to vector<18x1xi32>
    %15 = arith.remsi %11, %14 : vector<18x1xi32>
    %c0_i32_6 = arith.constant 0 : i32
    %16 = vector.broadcast %c0_i32_6 : i32 to vector<18x1xi32>
    %17 = arith.cmpi ne, %15, %16 : vector<18x1xi32>
    %c0_i32_7 = arith.constant 0 : i32
    %18 = vector.broadcast %c0_i32_7 : i32 to vector<18x1xi32>
    %19 = arith.cmpi slt, %15, %18 : vector<18x1xi32>
    %c0_i32_8 = arith.constant 0 : i32
    %20 = arith.cmpi slt, %13, %c0_i32_8 : i32
    %21 = vector.broadcast %20 : i1 to vector<18x1xi1>
    %22 = vector.broadcast %21 : vector<18x1xi1> to vector<18x1xi1>
    %23 = arith.xori %19, %22 : vector<18x1xi1>
    %24 = arith.andi %23, %17 : vector<18x1xi1>
    %25 = vector.broadcast %13 : i32 to vector<18x1xi32>
    %26 = arith.addi %15, %25 : vector<18x1xi32>
    %27 = arith.select %24, %26, %15 : vector<18x1xi1>, vector<18x1xi32>
    %cst_9 = arith.constant 0.000000e+00 : f32
    %28 = vector.broadcast %cst_9 : f32 to vector<18x1xf32>
    %c0_10 = arith.constant 0 : index
    %29 = memref.load %arg3[%c0_10] : memref<4xf32, #tpu.memory_space<smem>>
    %c0_i32_11 = arith.constant 0 : i32
    %30 = vector.broadcast %c0_i32_11 : i32 to vector<18x1xi32>
    %31 = arith.cmpi eq, %27, %30 : vector<18x1xi32>
    %32 = vector.broadcast %29 : f32 to vector<18x1xf32>
    %33 = arith.select %31, %32, %28 : vector<18x1xi1>, vector<18x1xf32>
    %cst_12 = arith.constant 0.000000e+00 : f32
    %34 = arith.addf %cst_12, %29 : f32
    %c1 = arith.constant 1 : index
    %35 = memref.load %arg3[%c1] : memref<4xf32, #tpu.memory_space<smem>>
    %c1_i32_13 = arith.constant 1 : i32
    %36 = vector.broadcast %c1_i32_13 : i32 to vector<18x1xi32>
    %37 = arith.cmpi eq, %27, %36 : vector<18x1xi32>
    %38 = vector.broadcast %35 : f32 to vector<18x1xf32>
    %39 = arith.select %37, %38, %33 : vector<18x1xi1>, vector<18x1xf32>
    %40 = arith.addf %34, %35 : f32
    %c2 = arith.constant 2 : index
    %41 = memref.load %arg3[%c2] : memref<4xf32, #tpu.memory_space<smem>>
    %c2_i32 = arith.constant 2 : i32
    %42 = vector.broadcast %c2_i32 : i32 to vector<18x1xi32>
    %43 = arith.cmpi eq, %27, %42 : vector<18x1xi32>
    %44 = vector.broadcast %41 : f32 to vector<18x1xf32>
    %45 = arith.select %43, %44, %39 : vector<18x1xi1>, vector<18x1xf32>
    %46 = arith.addf %40, %41 : f32
    %cst_14 = arith.constant 6.000000e+00 : f32
    %47 = arith.mulf %46, %cst_14 : f32
    %cst_15 = arith.constant dense<0.000000e+00> : vector<10xf32>
    %48 = vector.multi_reduction <add>, %10, %cst_15 [0] : vector<18x10xf32> to vector<10xf32>
    %49 = vector.shape_cast %48 : vector<10xf32> to vector<1x10xf32>
    %50 = arith.mulf %10, %10 : vector<18x10xf32>
    %cst_16 = arith.constant dense<0.000000e+00> : vector<10xf32>
    %51 = vector.multi_reduction <add>, %50, %cst_16 [0] : vector<18x10xf32> to vector<10xf32>
    %52 = vector.shape_cast %51 : vector<10xf32> to vector<1x10xf32>
    %53 = vector.broadcast %45 : vector<18x1xf32> to vector<18x10xf32>
    %54 = arith.mulf %10, %53 : vector<18x10xf32>
    %cst_17 = arith.constant dense<0.000000e+00> : vector<10xf32>
    %55 = vector.multi_reduction <add>, %54, %cst_17 [0] : vector<18x10xf32> to vector<10xf32>
    %56 = vector.shape_cast %55 : vector<10xf32> to vector<1x10xf32>
    %cst_18 = arith.constant 1.800000e+01 : f32
    %57 = vector.broadcast %cst_18 : f32 to vector<1x10xf32>
    %58 = arith.divf %49, %57 : vector<1x10xf32>
    %cst_19 = arith.constant 1.800000e+01 : f32
    %59 = vector.broadcast %cst_19 : f32 to vector<1x10xf32>
    %60 = arith.divf %52, %59 : vector<1x10xf32>
    %61 = arith.mulf %58, %58 : vector<1x10xf32>
    %62 = arith.subf %60, %61 : vector<1x10xf32>
    %cst_20 = arith.constant 9.99999974E-6 : f32
    %63 = vector.broadcast %cst_20 : f32 to vector<1x10xf32>
    %64 = arith.addf %62, %63 : vector<1x10xf32>
    %65 = math.rsqrt %64 : vector<1x10xf32>
    %66 = arith.mulf %5, %65 : vector<1x10xf32>
    %67 = vector.broadcast %47 : f32 to vector<1x10xf32>
    %68 = arith.mulf %58, %67 : vector<1x10xf32>
    %69 = arith.subf %56, %68 : vector<1x10xf32>
    %70 = arith.mulf %66, %69 : vector<1x10xf32>
    %71 = vector.broadcast %47 : f32 to vector<1x10xf32>
    %72 = arith.mulf %6, %71 : vector<1x10xf32>
    %73 = arith.addf %70, %72 : vector<1x10xf32>
    %cst_21 = arith.constant dense<0.000000e+00> : vector<1xf32>
    %74 = vector.multi_reduction <add>, %73, %cst_21 [1] : vector<1x10xf32> to vector<1xf32>
    %75 = vector.shape_cast %74 : vector<1xf32> to vector<1x1xf32>
    %c3 = arith.constant 3 : index
    %76 = memref.load %arg3[%c3] : memref<4xf32, #tpu.memory_space<smem>>
    %77 = vector.broadcast %76 : f32 to vector<1x1xf32>
    %78 = arith.addf %75, %77 : vector<1x1xf32>
    %c0_22 = arith.constant 0 : index
    %c0_23 = arith.constant 0 : index
    %79 = vector.load %arg4[%c0_22, %c0_23] : memref<1x1xf32, #tpu.memory_space<vmem>>, vector<1x1xf32>
    tpu.vector_store %arg4[%c0_22, %c0_23], %78 {strides = array<i32>} : memref<1x1xf32, #tpu.memory_space<vmem>>, vector<1x1xf32>,
    return
  }
}

</mosaic_0001>

<bundles_post_ra>
// kernel: _forward.1
= control target key start
LH: loop header
LB: loop body
LE: loop exit
PB: predicated region body
PF: predicated region fallthrough
CT: control target
= control target key end

     0   :  { %9 = vsyncpa [#allocation4], 0  ;;  %s580_s0 = inlined_call_operand.vmem [shape: f32[18,90], index: 0, kind: input, shape index: {}]   ;;  %s581_s1 = inlined_call_operand.vmem [shape: f32[90,10], index: 1, kind: input, shape index: {}]   ;;  %s582_s2 = inlined_call_operand.vmem [shape: f32[3,10], index: 2, kind: input, shape index: {}]   ;;  %s583_s3 = inlined_call_operand.vmem [shape: f32[4], index: 3, kind: input, shape index: {}]   ;;  %s584_s4 = inlined_call_operand.hbm [shape: f32[1,1], index: 4, kind: output, shape index: {}]  }
   0x1   :  { %10 = vsyncpa [#allocation3], 0  ;;  %s23_s17 = sshll.u32 %s583_s3, 4  ;;  %s24_s17 = int_to_ptr.vmem [resolvable:$true] %s23_s17 }
   0x2   :  { %s410_s18 = scalar_lea.vmem %s24_s17, 16  ;;  %p415_p1 = scmp.lt.s32.totalorder %s24_s17, %s24_s17 }
   0x3   :  { %p411_p0 = scmp.ne.s32.totalorder %s24_s17, %s410_s18  ;;  %p416_p2 = scmp.lt.s32.totalorder %s410_s18, %s410_s18 }
   0x5   :  { %p417_p3 = por %p416_p2, %p415_p1 }
   0x7   :  { %p418_p4 = pnand %p417_p3, %p411_p0 }
   0x9   :  { %421 = shalt.err (!%p418_p4)
}
   0xa   :  { %s448_s19 = smov [#allocation2]  }
   0xb   :  { %26 = dma.vmem_to_smem %s24_s17, 16, %s448_s19, [#allocation4]  }
   0xc   :  { %444 = dma.done.wait [#allocation4], 16  }
   0xd   :  { %445 = vsyncadd [#allocation4], 4294967280 }
   0xe   :  { %30 = sfence }
   0xf   :  { %v34_v0 = vld [vmem:[%s581_s1] sm:$0xff]  ;;  %v35_v1 = vld [vmem:[%s581_s1 + $0x8] sm:$0xff]  ;;  %v36_v2 = vld [vmem:[%s581_s1 + $0x10] sm:$0xff]  ;;  %v449_v3 = vmov 0.0|0.0   ;;  %vm450_vm0 = vmmov 0   ;;  %v451_v6 = vmov 0.0   ;;  %v47_v23 = vlaneseq }
  0x10   :  { %365 = vmatprep.subr.bf16.mxu0 %v449_v3  ;;  %384 = vmatprep.subr.bf16.mxu1 %v449_v3  ;;  %v366_v4 = vpack.c.bf16 %v35_v1, %v34_v0  ;;  %v37_v5 = vld [vmem:[%s581_s1 + $0x18] sm:$0xff]  ;;  %v38_v8 = vld [vmem:[%s581_s1 + $0x20] sm:$0xff]  ;;  %v39_v9 = vld [vmem:[%s581_s1 + $0x28] sm:$0xff]  ;;  %vm61_vm1 = vcmask 1041408   ;;  %vm452_vm2 = vmmov 1   ;;  %vm51_vm4 = vcmask 736256  }
  0x11   :  { %356 = vmatprep.mubr.msk.f32.mxu0 %vm450_vm0, %v451_v6  ;;  %359 = vmatprep.mubr.msk.f32.mxu1 %vm450_vm0, %v451_v6  ;;  %v369_v7 = vpack.c.bf16 %v37_v5, %v36_v2  ;;  %v372_v10 = vpack.c.bf16 %v39_v9, %v38_v8  ;;  %v40_v11 = vld [vmem:[%s581_s1 + $0x30] sm:$0xff]  ;;  %v41_v12 = vld [vmem:[%s581_s1 + $0x38] sm:$0xff]  ;;  %v42_v14 = vld [vmem:[%s581_s1 + $0x40] sm:$0xff]  ;;  %v48_v24 = vshrl.u32 %v47_v23, 7  ;;  %s544_s22 = sld [smem:[#allocation2 + $0x1]]  ;;  %s546_s23 = sld [smem:[#allocation2 + $0x2]] }
  0x12   :  { %367 = vmatpush3.bf16.msra.mxu0 %v366_v4  ;;  %390 = vmatpush3.bf16.msra.mxu1 %v366_v4  ;;  %v375_v13 = vpack.c.bf16 %v41_v12, %v40_v11  ;;  %v43_v15 = vld [vmem:[%s581_s1 + $0x48] sm:$0xff]  ;;  %v44_v17 = vld [vmem:[%s581_s1 + $0x50] sm:$0xff]  ;;  %v45_v18 = vld [vmem:[%s581_s1 + $0x58] sm:$0x3]  ;;  %s316_s27 = sld [smem:[#allocation2 + $0x3]]  ;;  %s453_s28 = smov [#allocation5]  }
  0x13   :  { %368 = vmatprep.subr.bf16.mxu0 %v449_v3  ;;  %385 = vmatprep.subr.bf16.mxu1 %v449_v3  ;;  %v378_v16 = vpack.c.bf16 %v43_v15, %v42_v14  ;;  %v381_v19 = vpack.c.bf16 %v45_v18, %v44_v17  ;;  %vm382_vm3 = vmpackc.low %vm61_vm1, %vm452_vm2  ;;  %v31_v20 = vld [vmem:[%s580_s0] sm:$0xff]  ;;  %v32_v21 = vld [vmem:[%s580_s0 + $0x8] sm:$0xff]  ;;  %v150_v25 = vadd.s32 8, %v48_v24  ;;  %v151_v30 = vadd.s32 16, %v48_v24  ;;  %s301_s29 = sshll.u32 %s453_s28, 4  ;;  %s302_s29 = int_to_ptr.vmem [resolvable:$true] %s301_s29 }
  0x14   :  { %v33_v22 = vld [vmem:[%s580_s0 + $0x10] sm:$0x3]  ;;  %v530_v26 = vmul.u32.u64.low 2863311531, %v48_v24  ;;  %v531_v27 = vmul.u32.u64.high 2863311531, %v48_v24, %v530_v26  ;;  %s542_s0 = sld [smem:[#allocation2]]  ;;  %v49_v47 = vsub.s32 0, %v48_v24  ;;  %p427_p6 = scmp.lt.s32.totalorder %s302_s29, %s302_s29 }
  0x15   :  { %v533_v28 = vmul.u32.u64.low 2863311531, %v150_v25  ;;  %v534_v29 = vmul.u32.u64.high 2863311531, %v150_v25, %v533_v28  ;;  %v536_v31 = vmul.u32.u64.low 2863311531, %v151_v30  ;;  %v537_v32 = vmul.u32.u64.high 2863311531, %v151_v30, %v536_v31  ;;  %v552_v49 = vld [vmem:[%s582_s2] sm:$0x7] }
  0x16   :  { %370 = vmatpush3.bf16.msra.mxu0 %v369_v7  ;;  %391 = vmatpush3.bf16.msra.mxu1 %v369_v7  ;;  %v158_v33 = vshrl.u32 %v531_v27, 1  ;;  %v50_v53 = vrot.slane %v552_v49, %v49_v47  ;;  %s422_s30 = scalar_lea.vmem %s302_s29, 16  ;;  %s426_s5 = scalar_lea.vmem %s302_s29, 32 }
  0x17   :  { %371 = vmatprep.subr.bf16.mxu0 %v449_v3  ;;  %386 = vmatprep.subr.bf16.mxu1 %v449_v3  ;;  %v169_v34 = vshrl.u32 %v534_v29, 1  ;;  %v180_v37 = vshrl.u32 %v537_v32, 1  ;;  %v213_v52 = vstv %s544_s22  ;;  %v222_v56 = vstv %s546_s23  ;;  %p423_p5 = scmp.ne.s32.totalorder %s302_s29, %s422_s30  ;;  %p428_p7 = scmp.lt.s32.totalorder %s426_s5, %s422_s30 }
  0x18   :  { %v159_v35 = vmul.u32 3, %v158_v33 }
  0x19   :  { %v170_v36 = vmul.u32 3, %v169_v34  ;;  %v181_v40 = vmul.u32 3, %v180_v37  ;;  %p429_p8 = por %p428_p7, %p427_p6 }
  0x1a   :  { %373 = vmatpush3.bf16.msra.mxu0 %v372_v10  ;;  %392 = vmatpush3.bf16.msra.mxu1 %v372_v10  ;;  %v160_v38 = vsub.s32 %v48_v24, %v159_v35  ;;  %v204_v48 = vstv %s542_s0  ;;  %s217_s2 = sadd.f32 %s544_s22, %s542_s0 }
  0x1b   :  { %374 = vmatprep.subr.bf16.mxu0 %v449_v3  ;;  %387 = vmatprep.subr.bf16.mxu1 %v449_v3  ;;  %v171_v39 = vsub.s32 %v150_v25, %v170_v36  ;;  %v182_v41 = vsub.s32 %v151_v30, %v181_v40  ;;  %p430_p9 = pnand %p429_p8, %p423_p5 }
  0x1c   :  { %vm185_vm5 = vcmp.ne.s32.totalorder %v160_v38, 0  ;;  %vm188_vm6 = vcmp.lt.s32.totalorder %v160_v38, 0  ;;  %v194_v42 = vadd.s32 3, %v160_v38  ;;  %s226_s25 = sadd.f32 %s546_s23, %s217_s2 }
  0x1d   :  { %vm186_vm7 = vcmp.ne.s32.totalorder %v171_v39, 0  ;;  %vm189_vm8 = vcmp.lt.s32.totalorder %v171_v39, 0  ;;  %vm191_vm9 = vmand %vm188_vm6, %vm185_vm5  ;;  %v195_v43 = vadd.s32 3, %v171_v39  ;;  %vm187_vm11 = vcmp.ne.s32.totalorder %v182_v41, 0 }
  0x1e   :  { %376 = vmatpush3.bf16.msra.mxu0 %v375_v13  ;;  %393 = vmatpush3.bf16.msra.mxu1 %v375_v13  ;;  %vm192_vm10 = vmand %vm189_vm8, %vm186_vm7  ;;  %vm190_vm12 = vcmp.lt.s32.totalorder %v182_v41, 0  ;;  %v197_v44 = vsel %vm191_vm9, %v194_v42, %v160_v38  ;;  %v196_v46 = vadd.s32 3, %v182_v41  ;;  %vm228_vm6 = vcmask 80896   ;;  %s227_s26 = smul.f32 6.0, %s226_s25 }
  0x1f   :  { %377 = vmatprep.subr.bf16.mxu0 %v449_v3  ;;  %388 = vmatprep.subr.bf16.mxu1 %v449_v3  ;;  %v198_v45 = vsel %vm192_vm10, %v195_v43, %v171_v39  ;;  %vm193_vm13 = vmand %vm190_vm12, %vm187_vm11  ;;  %vm201_vm14 = vcmp.eq.s32.totalorder %v197_v44, 0  ;;  %vm232_vm8 = vcmask 74752   ;;  %vm286_vm9 = vcmask 74753  }
  0x20   :  { %vm202_vm15 = vcmp.eq.s32.totalorder %v198_v45, 0  ;;  %v199_v50 = vsel %vm193_vm13, %v196_v46, %v182_v41  ;;  %v205_v51 = vsel %vm201_vm14, %v204_v48, 0.0  ;;  %vm211_vm1 = vcmp.eq.s32.totalorder %v198_v45, 1 }
  0x21   :  { %v206_v54 = vsel %vm202_vm15, %v204_v48, 0.0  ;;  %vm203_vm2 = vcmp.eq.s32.totalorder %v199_v50, 0  ;;  %vm212_vm5 = vcmp.eq.s32.totalorder %v199_v50, 1  ;;  %vm221_vm7 = vcmp.eq.s32.totalorder %v199_v50, 2 }
  0x22   :  { %379 = vmatpush3.bf16.msra.mxu0 %v378_v16  ;;  %394 = vmatpush3.bf16.msra.mxu1 %v378_v16  ;;  %v215_v59 = vsel %vm211_vm1, %v213_v52, %v206_v54  ;;  %v207_v0 = vsel %vm203_vm2, %v204_v48, 0.0  ;;  %v277_v48 = vstv %s227_s26  ;;  %vm293_vm10 = vcmask 1025  }
  0x23   :  { %380 = vmatprep.subr.bf16.mxu0 %v449_v3  ;;  %389 = vmatprep.subr.bf16.mxu1 %v449_v3 }
  0x26   :  { %383 = vmatpush3.bf16.msk.msra.mxu0 %vm382_vm3, %v381_v19  ;;  %395 = vmatpush3.bf16.msk.msra.mxu1 %vm382_vm3, %v381_v19  ;;  %vm219_vm3 = vcmp.eq.s32.totalorder %v197_v44, 2 }
  0x29   :  { %357 = vmatmul.mubr.msk.f32.vlgmr.msra.gmra.mrb[0].mxu0 %vm51_vm4, %v31_v20  ;;  %360 = vmatmul.mubr.msk.f32.vlgmr.msra.gmra.mrb[0].mxu1 %vm51_vm4, %v32_v21 }
  0x2a   :  { %362 = vmatprep.mubr.msk.f32.mxu1 %vm450_vm0, %v451_v6  ;;  %vm210_vm0 = vcmp.eq.s32.totalorder %v197_v44, 1  ;;  %v216_v6 = vsel %vm212_vm5, %v213_v52, %v207_v0 }
  0x2b   :  { %v214_v55 = vsel %vm210_vm0, %v213_v52, %v205_v51  ;;  %v225_v18 = vsel %vm221_vm7, %v222_v56, %v216_v6 }
  0x2c   :  { %v223_v1 = vsel %vm219_vm3, %v222_v56, %v214_v55 }
  0x2d   :  { %363 = vmatmul.mubr.msk.f32.gmra.mrb[2].mxu1 %vm51_vm4, %v33_v22  ;;  %vm220_vm4 = vcmp.eq.s32.totalorder %v198_v45, 2 }
  0x2e   :  { %v224_v4 = vsel %vm220_vm4, %v222_v56, %v215_v59  ;;  %v281_v59 = vmul.f32 %v277_v48, %v552_v49 }
  0xfc   :  { %v131_v57 = vpop.f32.mrb[0].mxu0  ;;  %v136_v58 = vpop.f32.mrb[0].mxu1 }
  0xfd   :  { %v132_v60 = vadd.f32 %v131_v57, %v50_v53  ;;  %v137_v61 = vadd.f32 %v136_v58, %v50_v53  ;;  %v361_v62 = vpop.f32.mrb[1].mxu1  ;;  %v358_v63 = vpop.f32.mrb[1].mxu0 }
  0xfe   :  { %v283_v62 = vrot.slane %v281_v59, 1 }
  0xff   :  { %v145_v2 = vmax.f32 %v132_v60, 0.0  ;;  %v146_v3 = vmax.f32 %v137_v61, 0.0 }
 0x100   :  { %v141_v5 = vpop.f32.mrb[2].mxu1 }
 0x101   :  { %v229_v7 = vsel %vm228_vm6, %v145_v2, 0.0  ;;  %v241_v8 = vmul.f32 %v145_v2, %v145_v2  ;;  %v255_v9 = vmul.f32 %v223_v1, %v145_v2  ;;  %v230_v10 = vsel %vm228_vm6, %v146_v3, 0.0  ;;  %v364_v11 = vpop.f32.mrb[3].mxu1 }
 0x102   :  { %v231_v12 = vadd.f32 %v230_v10, %v229_v7  ;;  %v242_v13 = vmul.f32 %v146_v3, %v146_v3  ;;  %v256_v14 = vmul.f32 %v224_v4, %v146_v3  ;;  %v142_v15 = vadd.f32 %v141_v5, %v50_v53 }
 0x103   :  { %v244_v16 = vsel %vm228_vm6, %v241_v8, 0.0  ;;  %v258_v17 = vsel %vm228_vm6, %v255_v9, 0.0  ;;  %v291_v2 = vstv %s316_s27 }
 0x104   :  { %v245_v19 = vsel %vm228_vm6, %v242_v13, 0.0  ;;  %v259_v20 = vsel %vm228_vm6, %v256_v14, 0.0  ;;  %v147_v21 = vmax.f32 %v142_v15, 0.0 }
 0x105   :  { %v246_v22 = vadd.f32 %v245_v19, %v244_v16  ;;  %v260_v23 = vadd.f32 %v259_v20, %v258_v17 }
 0x106   :  { %v233_v24 = vsel %vm232_vm8, %v147_v21, 0.0  ;;  %v243_v25 = vmul.f32 %v147_v21, %v147_v21  ;;  %v257_v26 = vmul.f32 %v225_v18, %v147_v21 }
 0x107   :  { %v234_v27 = vadd.f32 %v233_v24, %v231_v12 }
 0x108   :  { %v247_v28 = vsel %vm232_vm8, %v243_v25, 0.0  ;;  %v261_v29 = vsel %vm232_vm8, %v257_v26, 0.0 }
 0x109   :  { %v235_v30 = vrot.slane %v234_v27, 4  ;;  %v248_v31 = vadd.f32 %v247_v28, %v246_v22  ;;  %v262_v32 = vadd.f32 %v261_v29, %v260_v23 }
 0x10b   :  { %v236_v33 = vadd.f32 %v235_v30, %v234_v27  ;;  %v249_v34 = vrot.slane %v248_v31, 4  ;;  %v263_v35 = vrot.slane %v262_v32, 4 }
 0x10d   :  { %v237_v36 = vrot.slane %v236_v33, 2  ;;  %v250_v37 = vadd.f32 %v249_v34, %v248_v31  ;;  %v264_v38 = vadd.f32 %v263_v35, %v262_v32 }
 0x10f   :  { %v238_v39 = vadd.f32 %v237_v36, %v236_v33  ;;  %v251_v40 = vrot.slane %v250_v37, 2  ;;  %v265_v41 = vrot.slane %v264_v38, 2 }
 0x111   :  { %v252_v42 = vadd.f32 %v251_v40, %v250_v37  ;;  %v239_v43 = vrot.slane %v238_v39, 1  ;;  %v266_v44 = vadd.f32 %v265_v41, %v264_v38 }
 0x113   :  { %v253_v45 = vrot.slane %v252_v42, 1  ;;  %v240_v46 = vadd.f32 %v239_v43, %v238_v39  ;;  %v267_v47 = vrot.slane %v266_v44, 1 }
 0x115   :  { %v254_v50 = vadd.f32 %v253_v45, %v252_v42  ;;  %v270_v51 = vmul.f32 0.055555556, %v240_v46  ;;  %v268_v52 = vadd.f32 %v267_v47, %v266_v44 }
 0x117   :  { %v271_v53 = vmul.f32 0.055555556, %v254_v50  ;;  %v272_v54 = vmul.f32 %v270_v51, %v270_v51  ;;  %v278_v55 = vmul.f32 %v277_v48, %v270_v51 }
 0x119   :  { %v273_v56 = vsub.f32 %v271_v53, %v272_v54  ;;  %v279_v57 = vsub.f32 %v268_v52, %v278_v55 }
 0x11b   :  { %v274_v58 = vadd.f32 1e-05, %v273_v56 }
 0x11d   :  { %408 = vrsqrt.f32 %v274_v58 }
 0x127   :  { %v409_v60 = vpop.eup %408 }
 0x128   :  { %v276_v61 = vmul.f32 %v409_v60, %v552_v49 }
 0x12a   :  { %v280_v63 = vmul.f32 %v279_v57, %v276_v61 }
 0x12c   :  { %v285_v0 = vadd.f32 %v283_v62, %v280_v63 }
 0x12e   :  { %v287_v1 = vsel %vm286_vm9, %v285_v0, 0.0 }
 0x12f   :  { %288 = vadd.xlane.f32.xlu0 %v287_v1 }
 0x1bc   :  { %v289_v3 = vpop.xlane.xlu0 %288 }
 0x1bd   :  { %v292_v4 = vadd.f32 %v291_v2, %v289_v3 }
 0x1bf   :  { %294 = vst.msk [vmem:[#allocation5 - $0x1] sm:$0x2] %vm293_vm10, %v292_v4 }
 0x1c0   :  { %433 = shalt.err (!%p430_p9)
}
 0x1c1   :  { %s434_s8 = scalar_lea.hbm %s584_s4, 16 }
 0x1c2   :  { %p435_p10 = scmp.ne.s32.totalorder %s584_s4, %s434_s8  ;;  %p438_p11 = scmp.lt.u32.totalorder %s434_s8, %s584_s4 }
 0x1c4   :  { %p440_p12 = pnand %p438_p11, %p435_p10 }
 0x1c6   :  { %443 = shalt.err (!%p440_p12)
}
 0x1c7   :  { %304 = dma.vmem_to_hbm [thread:$0]  %s302_s29, 16, %s584_s4, [#allocation3]  }
 0x1c8   :  { %446 = dma.done.wait [#allocation3], 16  }
 0x1c9   :  { %447 = vsyncadd [#allocation3], 4294967280 }
 0x1ca   :  { %308 = vsyncpa [#allocation3], 1 }
 0x1cb   :  { %309 = vsyncpa [#allocation4], 1 }

</bundles_post_ra>
